<compile_context>
chip_gen: v7x
topology: tpu7x:2x2x1
jax: 0.10.0
libtpu: 0.0.40
codegen_flags: <defaults>
</compile_context>

<pallas_src>
import functools

import jax
import jax.numpy as jnp
from jax.experimental import pallas as pl
from jax.experimental.pallas import tpu as pltpu


# ----------------------------------------------------------------------------
# Generic linear:  out = x @ W^T + b   (W passed pre-transposed as w_t = W^T)
# ----------------------------------------------------------------------------
def _linear_kernel(x_ref, w_ref, b_ref, o_ref):
    x = x_ref[...]                                             # (tm, K)
    acc = jnp.dot(x, w_ref[...], preferred_element_type=jnp.float32)
    o_ref[...] = (acc + b_ref[...]).astype(o_ref.dtype)


def _round_up(n, m):
    return ((n + m - 1) // m) * m


def pallas_linear(x2d, w_t, b, *, tm_max=256):
    """x2d: [M, K], w_t: [K, N] (= W^T), b: [N] -> [M, N]."""
    M, K = x2d.shape
    N = w_t.shape[1]
    tm = min(tm_max, _round_up(M, 8))          # big row tile, sublane aligned
    Mp = _round_up(M, tm)                      # cdiv-style padding, no assert
    if Mp != M:
        x2d = jnp.pad(x2d, ((0, Mp - M), (0, 0)))

    out = pl.pallas_call(
        _linear_kernel,
        out_shape=jax.ShapeDtypeStruct((Mp, N), x2d.dtype),
        grid_spec=pltpu.PrefetchScalarGridSpec(
            num_scalar_prefetch=0,
            grid=(Mp // tm,),
            in_specs=[
                pl.BlockSpec((tm, K), lambda i: (i, 0)),       # x row tile
                pl.BlockSpec((K, N), lambda i: (0, 0)),        # W^T resident
                pl.BlockSpec((1, N), lambda i: (0, 0)),        # bias resident
            ],
            out_specs=pl.BlockSpec((tm, N), lambda i: (i, 0)),
        ),
        compiler_params=pltpu.CompilerParams(
            dimension_semantics=("parallel",),
            vmem_limit_bytes=64 * 1024 * 1024,
        ),
    )(x2d, w_t, b.reshape(1, N))
    return out[:M]


# ----------------------------------------------------------------------------
# Scaled-dot multi-head attention core: grid over batch, all heads per step.
# ----------------------------------------------------------------------------
def _mha_kernel(q_ref, k_ref, v_ref, mask_ref, o_ref, w_ref, *, scaling):
    q = q_ref[0]                                               # (H, S, Dh)
    k = k_ref[0]                                               # (H, T, Dh)
    v = v_ref[0]                                               # (H, T, Dh)

    s = jnp.einsum("hsd,htd->hst", q, k,
                   preferred_element_type=jnp.float32) * scaling
    s = jnp.where(mask_ref[...][None, :, :] != 0.0, -jnp.inf, s)

    m = jnp.max(s, axis=-1, keepdims=True)
    e = jnp.exp(s - m)
    p = e / jnp.sum(e, axis=-1, keepdims=True)                 # softmax
    # TODO(synk): dropout(p>0) on the attention weights would need
    # pltpu.prng_seed/prng_random_bits; module default p=0.0 -> identity.

    w_ref[0] = p.astype(w_ref.dtype)
    o = jnp.einsum("hst,htd->hsd", p.astype(v.dtype), v,
                   preferred_element_type=jnp.float32)
    o_ref[0] = o.astype(o_ref.dtype)


def pallas_mha(q4, k4, v4, mask_f, scaling):
    """q4: [B,H,S,Dh], k4/v4: [B,H,T,Dh], mask_f: [S,T] (1.0 = masked)."""
    B, H, S, Dh = q4.shape
    T = k4.shape[2]
    kernel = functools.partial(_mha_kernel, scaling=scaling)
    ctx, attw = pl.pallas_call(
        kernel,
        out_shape=(
            jax.ShapeDtypeStruct((B, H, S, Dh), q4.dtype),
            jax.ShapeDtypeStruct((B, H, S, T), jnp.float32),
        ),
        grid_spec=pltpu.PrefetchScalarGridSpec(
            num_scalar_prefetch=0,
            grid=(B,),
            in_specs=[
                pl.BlockSpec((1, H, S, Dh), lambda b: (b, 0, 0, 0)),
                pl.BlockSpec((1, H, T, Dh), lambda b: (b, 0, 0, 0)),
                pl.BlockSpec((1, H, T, Dh), lambda b: (b, 0, 0, 0)),
                pl.BlockSpec((S, T), lambda b: (0, 0)),        # shared mask
            ],
            out_specs=[
                pl.BlockSpec((1, H, S, Dh), lambda b: (b, 0, 0, 0)),
                pl.BlockSpec((1, H, S, T), lambda b: (b, 0, 0, 0)),
            ],
        ),
        compiler_params=pltpu.CompilerParams(
            dimension_semantics=("parallel",),
            vmem_limit_bytes=64 * 1024 * 1024,
        ),
    )(q4, k4, v4, mask_f)
    return ctx, attw


# ----------------------------------------------------------------------------
# Full module forward
# ----------------------------------------------------------------------------
def attention_forward(q, k, v, mask, in_proj_weight, in_proj_bias,
                      out_proj_weight, out_proj_bias, *, num_heads,
                      do_proj=True):
    E = in_proj_weight.shape[1]
    H = num_heads
    Dh = E // H
    scaling = float(Dh) ** -0.5
    B, S, _ = q.shape
    T = k.shape[1]

    if do_proj:
        Wq, Wk, Wv = (in_proj_weight[:E],
                      in_proj_weight[E:2 * E],
                      in_proj_weight[2 * E:])
        bq, bk, bv = (in_proj_bias[:E],
                      in_proj_bias[E:2 * E],
                      in_proj_bias[2 * E:])
        q = pallas_linear(q.reshape(B * S, E), Wq.T, bq).reshape(B, S, E)
        k = pallas_linear(k.reshape(B * T, E), Wk.T, bk).reshape(B, T, E)
        v = pallas_linear(v.reshape(B * T, E), Wv.T, bv).reshape(B, T, E)

    # split heads: [B, L, E] -> [B, H, L, Dh]   (pure layout)
    q4 = q.reshape(B, S, H, Dh).transpose(0, 2, 1, 3)
    k4 = k.reshape(B, T, H, Dh).transpose(0, 2, 1, 3)
    v4 = v.reshape(B, T, H, Dh).transpose(0, 2, 1, 3)

    mask_f = mask.astype(jnp.float32)
    ctx4, attw4 = pallas_mha(q4, k4, v4, mask_f, scaling)

    # concat heads: [B, H, S, Dh] -> [B, S, E]
    ctx = ctx4.transpose(0, 2, 1, 3).reshape(B, S, E)
    out = pallas_linear(ctx.reshape(B * S, E), out_proj_weight.T,
                        out_proj_bias).reshape(B, S, E)
    attw = attw4.reshape(B * H, S, T)
    return out, attw


# ----------------------------------------------------------------------------
# Pure-JAX reference (same math as the PyTorch forward, dropout p=0)
# ----------------------------------------------------------------------------
def reference_forward(q, k, v, mask, Win, bin_, Wout, bout, num_heads):
    E = Win.shape[1]
    H = num_heads
    Dh = E // H
    scaling = float(Dh) ** -0.5
    hp = jax.lax.Precision.HIGHEST
    qp = jnp.einsum("ble,fe->blf", q, Win[:E], precision=hp) + bin_[:E]
    kp = jnp.einsum("ble,fe->blf", k, Win[E:2 * E], precision=hp) + bin_[E:2 * E]
    vp = jnp.einsum("ble,fe->blf", v, Win[2 * E:], precision=hp) + bin_[2 * E:]
    B, S, _ = q.shape
    T = k.shape[1]

    def split(x):
        b, l, _ = x.shape
        return x.reshape(b, l, H, Dh).transpose(0, 2, 1, 3).reshape(b * H, l, Dh)

    qh, kh, vh = split(qp), split(kp), split(vp)
    scores = jnp.einsum("bsd,btd->bst", qh, kh, precision=hp) * scaling
    scores = jnp.where(mask[None, :, :], -jnp.inf, scores)
    w = jax.nn.softmax(scores, axis=-1)
    o = jnp.einsum("bst,btd->bsd", w, vh, precision=hp)
    ctx = o.reshape(B, H, S, Dh).transpose(0, 2, 1, 3).reshape(B, S, E)
    out = jnp.einsum("bse,fe->bsf", ctx, Wout, precision=hp) + bout
    return out, w


if __name__ == "__main__":
    # Small deterministic problem: batch=2, seq=8, embed_dim=32, heads=4.
    B, S, T, E, H = 2, 8, 8, 32, 4
    key = jax.random.PRNGKey(0)
    kq, kk, kv, kw, kb, kwo, kbo = jax.random.split(key, 7)

    q = jax.random.normal(kq, (B, S, E), dtype=jnp.float32)
    k = jax.random.normal(kk, (B, T, E), dtype=jnp.float32)
    v = jax.random.normal(kv, (B, T, E), dtype=jnp.float32)

    in_proj_weight = jax.random.normal(kw, (3 * E, E), jnp.float32) * 0.1
    in_proj_bias = jax.random.normal(kb, (3 * E,), jnp.float32) * 0.1
    out_proj_weight = jax.random.normal(kwo, (E, E), jnp.float32) * 0.1
    out_proj_bias = jax.random.normal(kbo, (E,), jnp.float32) * 0.1

    # Causal-style boolean mask [S, T]; True -> masked (-inf), like masked_fill_.
    row = jnp.arange(S)[:, None]
    col = jnp.arange(T)[None, :]
    mask = col > row

    out, attw = attention_forward(q, k, v, mask, in_proj_weight, in_proj_bias,
                                  out_proj_weight, out_proj_bias, num_heads=H)
    out, attw = jax.block_until_ready((out, attw))

    ref_out, ref_w = reference_forward(q, k, v, mask, in_proj_weight,
                                       in_proj_bias, out_proj_weight,
                                       out_proj_bias, H)

    assert out.shape == (B, S, E)
    assert attw.shape == (B * H, S, T)
    assert jnp.allclose(out, ref_out, atol=2e-4, rtol=2e-4)
    assert jnp.allclose(attw, ref_w, atol=2e-4, rtol=2e-4)

    print("KERNEL_OK")
</pallas_src>

<mosaic_0001>
module attributes {stable_mosaic.version = 11 : i64} {
  func.func @_linear_kernel(%arg0: i32, %arg1: memref<16x32xf32, #tpu.memory_space<vmem>>, %arg2: memref<32x32xf32, #tpu.memory_space<vmem>>, %arg3: memref<1x32xf32, #tpu.memory_space<vmem>>, %arg4: memref<16x32xf32, #tpu.memory_space<vmem>>) attributes {dimension_semantics = [#tpu.dimension_semantics<parallel>], iteration_bounds = array<i64: 1>, scalar_prefetch = 0 : i64, scratch_operands = 0 : i64, tpu.core_type = #tpu.core_type<tc>, window_params = [{transform_indices = @transform_0, window_bounds = array<i64: 16, 32>}, {pipeline_mode = #tpu.pipeline_mode<synchronous>, transform_indices = @transform_1, window_bounds = array<i64: 32, 32>}, {pipeline_mode = #tpu.pipeline_mode<synchronous>, transform_indices = @transform_2, window_bounds = array<i64: 1, 32>}, {transform_indices = @transform_3, window_bounds = array<i64: 16, 32>}]} {
    %c0 = arith.constant 0 : index
    %c0_0 = arith.constant 0 : index
    %0 = vector.load %arg1[%c0, %c0_0] : memref<16x32xf32, #tpu.memory_space<vmem>>, vector<16x32xf32>
    %c0_1 = arith.constant 0 : index
    %c0_2 = arith.constant 0 : index
    %1 = vector.load %arg2[%c0_1, %c0_2] : memref<32x32xf32, #tpu.memory_space<vmem>>, vector<32x32xf32>
    %cst = arith.constant dense<0.000000e+00> : vector<16x32xf32>
    %2 = tpu.matmul %0, %1, %cst {dimension_numbers = #tpu.dot_dimension_numbers<[1], [0], [0], [1], [0, 0, 1, 1], [], []>} : vector<16x32xf32>, vector<32x32xf32>, vector<16x32xf32> -> vector<16x32xf32>
    %c0_3 = arith.constant 0 : index
    %c0_4 = arith.constant 0 : index
    %3 = vector.load %arg3[%c0_3, %c0_4] : memref<1x32xf32, #tpu.memory_space<vmem>>, vector<1x32xf32>
    %4 = vector.broadcast %3 : vector<1x32xf32> to vector<16x32xf32>
    %5 = arith.addf %2, %4 : vector<16x32xf32>
    %c0_5 = arith.constant 0 : index
    %c0_6 = arith.constant 0 : index
    %6 = vector.load %arg4[%c0_5, %c0_6] : memref<16x32xf32, #tpu.memory_space<vmem>>, vector<16x32xf32>
    tpu.vector_store %arg4[%c0_5, %c0_6], %5 {strides = array<i32>} : memref<16x32xf32, #tpu.memory_space<vmem>>, vector<16x32xf32>,
    return
  }
  func.func @transform_0(%arg0: i32) -> (i32, i32) {
    %c0_i32 = arith.constant 0 : i32
    %c0_i32_0 = arith.constant 0 : i32
    return %arg0, %c0_i32 : i32, i32
  }
  func.func @transform_1(%arg0: i32) -> (i32, i32) {
    %c0_i32 = arith.constant 0 : i32
    %c0_i32_0 = arith.constant 0 : i32
    %c0_i32_1 = arith.constant 0 : i32
    return %c0_i32, %c0_i32_0 : i32, i32
  }
  func.func @transform_2(%arg0: i32) -> (i32, i32) {
    %c0_i32 = arith.constant 0 : i32
    %c0_i32_0 = arith.constant 0 : i32
    %c0_i32_1 = arith.constant 0 : i32
    return %c0_i32, %c0_i32_0 : i32, i32
  }
  func.func @transform_3(%arg0: i32) -> (i32, i32) {
    %c0_i32 = arith.constant 0 : i32
    %c0_i32_0 = arith.constant 0 : i32
    return %arg0, %c0_i32 : i32, i32
  }
}

</mosaic_0001>

<bundles_post_ra>
// kernel: tpu_custom_call.1
= control target key start
LH: loop header
LB: loop body
LE: loop exit
PB: predicated region body
PF: predicated region fallthrough
CT: control target
= control target key end

     0   :  { %8 = vsyncpa [#allocation3], 0  ;;  %s391_s0 = inlined_call_operand.hbm [shape: f32[16,32], index: 0, kind: input, shape index: {}]   ;;  %s392_s1 = inlined_call_operand.hbm [shape: f32[32,32], index: 1, kind: input, shape index: {}]   ;;  %s393_s2 = inlined_call_operand.hbm [shape: f32[1,32], index: 2, kind: input, shape index: {}]   ;;  %s394_s3 = inlined_call_operand.hbm [shape: f32[16,32], index: 3, kind: output, shape index: {}]  }
   0x1   :  { %9 = vsyncpa [#allocation6], 0 }
   0x2   :  { %10 = vsyncpa [#allocation4], 0  ;;  %s297_s12 = smov [#allocation5]   ;;  %s298_s14 = smov [#allocation2]  }
   0x3   :  { %s28_s13 = sshll.u32 %s297_s12, 4  ;;  %s16_s15 = sshll.u32 %s298_s14, 4  ;;  %s29_s13 = int_to_ptr.vmem [resolvable:$true] %s28_s13  ;;  %s323_s15 = int_to_ptr.vmem [resolvable:$true] %s16_s15 }
   0x4   :  { %s203_s18 = scalar_lea.hbm %s392_s1, 512 }
   0x5   :  { %p204_p0 = scmp.ne.s32.totalorder %s392_s1, %s203_s18  ;;  %p207_p1 = scmp.lt.u32.totalorder %s203_s18, %s392_s1 }
   0x7   :  { %p209_p2 = pnand %p207_p1, %p204_p0 }
   0x9   :  { %212 = shalt.err (!%p209_p2)
}
   0xa   :  { %s213_s23 = scalar_lea.vmem %s29_s13, 512  ;;  %p218_p4 = scmp.lt.s32.totalorder %s29_s13, %s29_s13 }
   0xb   :  { %p214_p3 = scmp.ne.s32.totalorder %s29_s13, %s213_s23  ;;  %p219_p5 = scmp.lt.s32.totalorder %s213_s23, %s213_s23 }
   0xd   :  { %p220_p6 = por %p219_p5, %p218_p4 }
   0xf   :  { %p221_p7 = pnand %p220_p6, %p214_p3 }
  0x11   :  { %224 = shalt.err (!%p221_p7)
}
  0x12   :  { %s299_s24 = smov 128   ;;  %s300_s25 = smov 8  }
  0x13   :  { %34 = dma.hbm_to_vmem [thread:$0]  %s392_s1, 512, %s29_s13, [#allocation6], %s299_s24, %s299_s24, %s300_s25  }
  0x14   :  { %s225_s30 = scalar_lea.hbm %s391_s0, 256 }
  0x15   :  { %p226_p8 = scmp.ne.s32.totalorder %s391_s0, %s225_s30  ;;  %p229_p9 = scmp.lt.u32.totalorder %s225_s30, %s391_s0 }
  0x17   :  { %p231_p10 = pnand %p229_p9, %p226_p8 }
  0x19   :  { %234 = shalt.err (!%p231_p10)
}
  0x1a   :  { %s235_s8 = scalar_lea.vmem %s323_s15, 256  ;;  %p240_p12 = scmp.lt.s32.totalorder %s323_s15, %s323_s15 }
  0x1b   :  { %p236_p11 = scmp.ne.s32.totalorder %s323_s15, %s235_s8  ;;  %p241_p13 = scmp.lt.s32.totalorder %s235_s8, %s235_s8 }
  0x1d   :  { %p242_p0 = por %p241_p13, %p240_p12 }
  0x1f   :  { %p243_p1 = pnand %p242_p0, %p236_p11 }
  0x21   :  { %246 = shalt.err (!%p243_p1)
}
  0x22   :  { %22 = dma.hbm_to_vmem [thread:$0]  %s391_s0, 256, %s323_s15, [#allocation3], %s299_s24, %s299_s24, %s300_s25  }
  0x23   :  { %s301_s10 = smov [#allocation7]   ;;  %s247_s14 = scalar_lea.hbm %s393_s2, 16 }
  0x24   :  { %s41_s11 = sshll.u32 %s301_s10, 4  ;;  %p248_p2 = scmp.ne.s32.totalorder %s393_s2, %s247_s14  ;;  %s42_s11 = int_to_ptr.vmem [resolvable:$true] %s41_s11 }
  0x25   :  { %p251_p3 = scmp.lt.u32.totalorder %s247_s14, %s393_s2 }
  0x27   :  { %p253_p4 = pnand %p251_p3, %p248_p2 }
  0x29   :  { %256 = shalt.err (!%p253_p4)
}
  0x2a   :  { %s257_s20 = scalar_lea.vmem %s42_s11, 16  ;;  %s261_s0 = scalar_lea.vmem %s42_s11, 32 }
  0x2b   :  { %p258_p5 = scmp.ne.s32.totalorder %s42_s11, %s257_s20  ;;  %p262_p6 = scmp.lt.s32.totalorder %s42_s11, %s42_s11 }
  0x2c   :  { %p263_p7 = scmp.lt.s32.totalorder %s261_s0, %s257_s20 }
  0x2e   :  { %p264_p8 = por %p263_p7, %p262_p6 }
  0x30   :  { %p265_p9 = pnand %p264_p8, %p258_p5 }
  0x32   :  { %268 = shalt.err (!%p265_p9)
}
  0x33   :  { %44 = dma.hbm_to_vmem [thread:$0]  %s393_s2, 16, %s42_s11, [#allocation6]  }
  0x34   :  { %291 = dma.done.wait [#allocation3], 256  }
  0x35   :  { %292 = vsyncadd [#allocation3], 4294967040 }
  0x36   :  { %293 = dma.done.wait [#allocation6], 528  }
  0x37   :  { %294 = vsyncadd [#allocation6], 4294966768  ;;  %vm67_vm0 = vcmask 261120   ;;  %v56_v0 = vld [vmem:[#allocation5] sm:$0xff]  ;;  %v57_v1 = vld [vmem:[#allocation5 + $0x8] sm:$0xff]  ;;  %s302_s2 = smov [#allocation8]  }
  0x38   :  { %v58_v2 = vld [vmem:[#allocation5 + $0x10] sm:$0xff]  ;;  %v189_v3 = vpack.c.bf16 %v57_v1, %v56_v0  ;;  %v59_v4 = vld [vmem:[#allocation5 + $0x18] sm:$0xff]  ;;  %v169_v8 = vld [vmem:[#allocation7] ss:$0 sm:$0xff]  ;;  %s156_s22 = sshll.u32 %s302_s2, 4  ;;  %s157_s22 = int_to_ptr.vmem [resolvable:$true] %s156_s22 }
  0x39   :  { %v54_v5 = vld [vmem:[#allocation2] sm:$0xff]  ;;  %v193_v6 = vpack.c.bf16 %v59_v4, %v58_v2  ;;  %v55_v7 = vld [vmem:[#allocation2 + $0x8] sm:$0xff]  ;;  %s269_s23 = scalar_lea.vmem %s157_s22, 256  ;;  %p274_p11 = scmp.lt.s32.totalorder %s157_s22, %s157_s22 }
  0x3a   :  { %186 = vmatprep.mubr.msk.f32.mxu0 %vm67_vm0, %v54_v5  ;;  %190 = vmatprep.subr.bf16.mxu0 %v189_v3  ;;  %p270_p10 = scmp.ne.s32.totalorder %s157_s22, %s269_s23  ;;  %p275_p12 = scmp.lt.s32.totalorder %s269_s23, %s269_s23 }
  0x3b   :  { %192 = vmatpush3.bf16.msra.mxu0 %v189_v3 }
  0x3c   :  { %194 = vmatprep.subr.bf16.mxu0 %v193_v6  ;;  %p276_p13 = por %p275_p12, %p274_p11 }
  0x3e   :  { %p277_p0 = pnand %p276_p13, %p270_p10 }
  0x3f   :  { %196 = vmatpush3.bf16.msra.mxu0 %v193_v6 }
  0x42   :  { %187 = vmatmul.mubr.msk.f32.vlgmr.msra.gmra.mrb[0].mxu0 %vm67_vm0, %v55_v7 }
 0x115   :  { %v188_v9 = vpop.f32.mrb[0].mxu0 }
 0x116   :  { %v146_v10 = vadd.f32 %v188_v9, %v169_v8  ;;  %v140_v11 = vpop.f32.mrb[1].mxu0 }
 0x117   :  { %v141_v12 = vadd.f32 %v169_v8, %v140_v11 }
 0x118   :  { %150 = vst.msk [vmem:[#allocation8 + $0x8] sm:$0xff] %vm67_vm0, %v146_v10 }
 0x119   :  { %149 = vst.msk [vmem:[#allocation8] sm:$0xff] %vm67_vm0, %v141_v12 }
 0x11a   :  { %280 = shalt.err (!%p277_p0)
}
 0x11b   :  { %s281_s28 = scalar_lea.hbm %s394_s3, 256 }
 0x11c   :  { %p282_p1 = scmp.ne.s32.totalorder %s394_s3, %s281_s28  ;;  %p285_p2 = scmp.lt.u32.totalorder %s281_s28, %s394_s3 }
 0x11e   :  { %p287_p3 = pnand %p285_p2, %p282_p1 }
 0x120   :  { %290 = shalt.err (!%p287_p3)
}
 0x121   :  { %162 = dma.vmem_to_hbm [thread:$0]  %s157_s22, 256, %s394_s3, [#allocation4], %s299_s24, %s299_s24, %s300_s25  }
 0x122   :  { %295 = dma.done.wait [#allocation4], 256  }
 0x123   :  { %296 = vsyncadd [#allocation4], 4294967040 }
 0x124   :  { %166 = vsyncpa [#allocation3], 1 }
 0x125   :  { %167 = vsyncpa [#allocation6], 1 }
 0x126   :  { %168 = vsyncpa [#allocation4], 1 }

</bundles_post_ra>
